<compile_context>
chip_gen: v7x
topology: tpu7x:2x2x1
jax: 0.10.0
libtpu: 0.0.40
codegen_flags: <defaults>
</compile_context>

<pallas_src>
import functools

import jax
import jax.numpy as jnp
from jax.experimental import pallas as pl
from jax.experimental.pallas import tpu as pltpu

# (name, in_features, out_features(scale), has_relu) -- exact concat order of
# MultiModalModel.forward().
MODALITIES = (
    ("desc",         32, 16, True),
    ("desc_glove",   40, 16, True),
    ("wiki",         24, 16, True),
    ("labels",       16,  8, True),
    ("descriptions", 16,  8, True),
    ("aliases",      16,  8, True),
    ("pages",        16,  8, True),
    ("claims",       16,  8, True),
    ("category",      8,  8, False),   # nn.Linear only, no ReLU
    ("type",          8,  8, False),   # nn.Linear only, no ReLU
)
K_IN_TOTAL = sum(m[1] for m in MODALITIES)    # 192 (concatenated input width)
TOTAL_SCALE = sum(m[2] for m in MODALITIES)   # 104 (concatenated feature width)
FEAT_PAD = 128                                # feature width padded to one lane tile
HIDDEN = 32
NUM_CLASSES = 3
OUT_WIDTH = 8                                 # trimmed output width (>= NUM_CLASSES)
BATCH = 8
NEG_BIG = -3.4e38                             # identity-lane "floor" (passes feat through)

# Parameter-slab row layout (all boundaries 8-row aligned, lane width 128).
R_WBLK = 0                                    # rows [0,192)   block-diagonal modality W
R_W1T = R_WBLK + K_IN_TOTAL                   # rows [192,320) classifier W1^T, zero-padded
R_W2T = R_W1T + FEAT_PAD                      # rows [320,448) classifier W2^T, zero-padded
R_MISC = R_W2T + FEAT_PAD                     # rows [448,456) b_blk / floor / b1 / b2
SLAB_ROWS = R_MISC + 8                        # 456

BM_CAP = 2048                                 # max batch-tile rows (fits all gens' VMEM)


def _round_up(x, m):
    return (x + m - 1) // m * m


def _mm_kernel(x_ref, slab_ref, out_ref, *, compute_dtype):
    """Fused forward: 3 MXU matmuls + 2 max ops, on one batch tile."""
    cd = compute_dtype
    # Static, tile-aligned views into the packed parameter slab (no data movement).
    w_blk = slab_ref[R_WBLK:R_WBLK + K_IN_TOTAL, :]     # (192,128) block-diag modality W
    w1t = slab_ref[R_W1T:R_W1T + FEAT_PAD, :]           # (128,128) classifier W1^T (padded)
    w2t = slab_ref[R_W2T:R_W2T + FEAT_PAD, :]           # (128,128) classifier W2^T (padded)
    misc = slab_ref[R_MISC:R_MISC + 8, :]                # (8,128): bias/floor rows
    b_blk = misc[0:1, :].astype(jnp.float32)             # packed modality bias
    floor = misc[1:2, :].astype(jnp.float32)             # 0.0 (relu lanes) / -3.4e38 (identity)
    b1 = misc[2:3, :].astype(jnp.float32)                # classifier b1 (lane-padded)
    b2 = misc[3:4, :].astype(jnp.float32)                # classifier b2 (lane-padded)

    x = x_ref[...].astype(cd)
    # (bm,192) @ (192,128): all 10 modality projections as one block-diag matmul.
    feat = jnp.dot(x, w_blk.astype(cd), preferred_element_type=jnp.float32) + b_blk
    # Per-modality ReLU vs identity as a single max against a constant floor row.
    feat = jnp.maximum(feat, floor)
    # (bm,128) @ (128,128): classifier layer 1 (zero-padded rows/cols are no-ops).
    h = jnp.dot(feat.astype(cd), w1t.astype(cd), preferred_element_type=jnp.float32) + b1
    h = jnp.maximum(h, 0.0)   # classifier ReLU; Dropout = identity in eval mode
    # (bm,128) @ (128,128): classifier layer 2; only lanes [0,3) are real.
    out = jnp.dot(h.astype(cd), w2t.astype(cd), preferred_element_type=jnp.float32) + b2
    # Trimmed writeback: store only the first OUT_WIDTH lanes (16x less HBM traffic).
    out_ref[...] = out[:, :OUT_WIDTH].astype(out_ref.dtype)


def pack_params(params, dtype=jnp.float32):
    """One-time packing of all invariant parameters into a single (456,128) slab.

    dtype=jnp.bfloat16 halves the (tiny) weight-read stream for throughput runs.
    """
    slab = jnp.zeros((SLAB_ROWS, FEAT_PAD), jnp.float32)
    # Block-diagonal modality weights + packed bias + ReLU floor.
    floor = jnp.zeros((FEAT_PAD,), jnp.float32)
    b_blk = jnp.zeros((FEAT_PAD,), jnp.float32)
    r = c = 0
    for name, in_f, out_f, has_relu in MODALITIES:
        slab = slab.at[R_WBLK + r:R_WBLK + r + in_f, c:c + out_f].set(params[f"{name}_wt"])
        b_blk = b_blk.at[c:c + out_f].set(params[f"{name}_b"][0])
        if not has_relu:
            # identity lanes: max(feat, -3.4e38) == feat
            floor = floor.at[c:c + out_f].set(NEG_BIG)
        r += in_f
        c += out_f
    # Classifier weights, zero-padded to full 128-lane tiles.
    slab = slab.at[R_W1T:R_W1T + TOTAL_SCALE, :HIDDEN].set(params["cls_w1t"])
    slab = slab.at[R_W2T:R_W2T + HIDDEN, :NUM_CLASSES].set(params["cls_w2t"])
    # Misc rows: [b_blk, floor, b1, b2, 0, 0, 0, 0].
    slab = slab.at[R_MISC + 0, :].set(b_blk)
    slab = slab.at[R_MISC + 1, :].set(floor)
    slab = slab.at[R_MISC + 2, :HIDDEN].set(params["cls_b1"][0])
    slab = slab.at[R_MISC + 3, :NUM_CLASSES].set(params["cls_b2"][0])
    return {"slab": slab.astype(dtype)}


def multi_modal_forward(inputs, packed, *, compute_dtype=jnp.float32,
                        storage_dtype=jnp.float32):
    """inputs: dict name -> (B, in_features); packed: output of pack_params().

    For throughput (v6e/v7x) use storage_dtype=compute_dtype=jnp.bfloat16 and
    pack_params(..., dtype=jnp.bfloat16); note bf16 will not meet 1e-4 allclose.
    """
    # Concatenate modalities host-side (outside pallas_call) -> one lane-dense input.
    x_cat = jnp.concatenate([inputs[name] for name, *_ in MODALITIES], axis=1)
    x_cat = x_cat.astype(storage_dtype)
    batch = x_cat.shape[0]

    # Batch tiling: one block at small batch; at large batch use big tiles
    # (>=85%-of-roofline regime) but always >=2 blocks so v7x's second
    # TensorCore is engaged via the "parallel" grid axis.
    b8 = _round_up(batch, 8)
    if b8 <= BM_CAP:
        bm = b8
    else:
        bm = min(BM_CAP, _round_up((b8 + 1) // 2, 8))
    b_pad = _round_up(b8, bm)
    if b_pad != batch:
        x_cat = jnp.pad(x_cat, ((0, b_pad - batch), (0, 0)))
    nb = b_pad // bm

    grid_spec = pltpu.PrefetchScalarGridSpec(
        num_scalar_prefetch=0,
        grid=(nb,),
        in_specs=[
            pl.BlockSpec((bm, K_IN_TOTAL), lambda i: (i, 0)),      # x_cat (moving)
            pl.BlockSpec((SLAB_ROWS, FEAT_PAD), lambda i: (0, 0)),  # param slab (resident)
        ],
        out_specs=pl.BlockSpec((bm, OUT_WIDTH), lambda i: (i, 0)),
    )
    # Note: if xprof shows exposed DMA on the x_cat stream at large batch, add
    # pipeline_mode=pl.Buffered(3) to the x_cat BlockSpec only.

    out = pl.pallas_call(
        functools.partial(_mm_kernel, compute_dtype=compute_dtype),
        out_shape=jax.ShapeDtypeStruct((b_pad, OUT_WIDTH), jnp.float32),
        grid_spec=grid_spec,
        compiler_params=pltpu.CompilerParams(
            dimension_semantics=("parallel",)),
    )(x_cat, packed["slab"])

    return out[:batch, :NUM_CLASSES]


def init_params(key):
    """Deterministic parameter init (same shapes as the PyTorch module)."""
    params = {}
    keys = jax.random.split(key, 2 * len(MODALITIES) + 4)
    k = 0
    for name, in_f, out_f, _ in MODALITIES:
        w = jax.random.normal(keys[k], (out_f, in_f), jnp.float32) / jnp.sqrt(in_f)
        b = jax.random.normal(keys[k + 1], (out_f,), jnp.float32) * 0.01
        params[f"{name}_wt"] = jnp.transpose(w)          # (in, out)
        params[f"{name}_b"] = b.reshape(1, out_f)        # (1, out)
        k += 2
    w1 = jax.random.normal(keys[k], (HIDDEN, TOTAL_SCALE), jnp.float32) / jnp.sqrt(TOTAL_SCALE)
    b1 = jax.random.normal(keys[k + 1], (HIDDEN,), jnp.float32) * 0.01
    w2 = jax.random.normal(keys[k + 2], (NUM_CLASSES, HIDDEN), jnp.float32) / jnp.sqrt(HIDDEN)
    b2 = jax.random.normal(keys[k + 3], (NUM_CLASSES,), jnp.float32) * 0.01
    params["cls_w1t"] = jnp.transpose(w1)                # (total, hidden)
    params["cls_b1"] = b1.reshape(1, HIDDEN)
    params["cls_w2t"] = jnp.transpose(w2)                # (hidden, 3)
    params["cls_b2"] = b2.reshape(1, NUM_CLASSES)
    return params


def reference_forward(inputs, params):
    """Pure-JAX reference mirroring the PyTorch forward (eval mode)."""
    feats = []
    for name, _, _, has_relu in MODALITIES:
        f = inputs[name] @ params[f"{name}_wt"] + params[f"{name}_b"]
        if has_relu:
            f = jnp.maximum(f, 0.0)
        feats.append(f)
    combined = jnp.concatenate(feats, axis=1)
    h = jnp.maximum(combined @ params["cls_w1t"] + params["cls_b1"], 0.0)
    return h @ params["cls_w2t"] + params["cls_b2"]


if __name__ == "__main__":
    root = jax.random.PRNGKey(0)
    pkey, xkey = jax.random.split(root)
    params = init_params(pkey)
    packed = pack_params(params)

    inputs = {}
    xkeys = jax.random.split(xkey, len(MODALITIES))
    for i, (name, in_f, _, _) in enumerate(MODALITIES):
        inputs[name] = jax.random.normal(xkeys[i], (BATCH, in_f), jnp.float32)

    out = multi_modal_forward(inputs, packed)   # f32 path for validation
    out = jax.block_until_ready(out)

    ref = reference_forward(inputs, params)
    assert out.shape == (BATCH, NUM_CLASSES)
    assert jnp.allclose(out, ref, atol=1e-4, rtol=1e-4), "Pallas kernel mismatch vs reference"
    print("KERNEL_OK")
</pallas_src>

<mosaic_0001>
module attributes {stable_mosaic.version = 11 : i64} {
  func.func @_mm_kernel(%arg0: i32, %arg1: memref<8x192xf32, #tpu.memory_space<vmem>>, %arg2: memref<456x128xf32, #tpu.memory_space<vmem>>, %arg3: memref<8x8xf32, #tpu.memory_space<vmem>>) attributes {dimension_semantics = [#tpu.dimension_semantics<parallel>], iteration_bounds = array<i64: 1>, scalar_prefetch = 0 : i64, scratch_operands = 0 : i64, tpu.core_type = #tpu.core_type<tc>, window_params = [{transform_indices = @transform_0, window_bounds = array<i64: 8, 192>}, {pipeline_mode = #tpu.pipeline_mode<synchronous>, transform_indices = @transform_1, window_bounds = array<i64: 456, 128>}, {transform_indices = @transform_2, window_bounds = array<i64: 8, 8>}]} {
    %c0 = arith.constant 0 : index
    %c0_0 = arith.constant 0 : index
    %0 = vector.load %arg2[%c0, %c0_0] : memref<456x128xf32, #tpu.memory_space<vmem>>, vector<192x128xf32>
    %c192 = arith.constant 192 : index
    %c0_1 = arith.constant 0 : index
    %1 = vector.load %arg2[%c192, %c0_1] : memref<456x128xf32, #tpu.memory_space<vmem>>, vector<128x128xf32>
    %c320 = arith.constant 320 : index
    %c0_2 = arith.constant 0 : index
    %2 = vector.load %arg2[%c320, %c0_2] : memref<456x128xf32, #tpu.memory_space<vmem>>, vector<128x128xf32>
    %c448 = arith.constant 448 : index
    %c0_3 = arith.constant 0 : index
    %3 = vector.load %arg2[%c448, %c0_3] : memref<456x128xf32, #tpu.memory_space<vmem>>, vector<8x128xf32>
    %4 = vector.extract_strided_slice %3 {offsets = [0, 0], sizes = [1, 128], strides = [1, 1]} : vector<8x128xf32> to vector<1x128xf32>
    %5 = vector.extract_strided_slice %3 {offsets = [1, 0], sizes = [1, 128], strides = [1, 1]} : vector<8x128xf32> to vector<1x128xf32>
    %6 = vector.extract_strided_slice %3 {offsets = [2, 0], sizes = [1, 128], strides = [1, 1]} : vector<8x128xf32> to vector<1x128xf32>
    %7 = vector.extract_strided_slice %3 {offsets = [3, 0], sizes = [1, 128], strides = [1, 1]} : vector<8x128xf32> to vector<1x128xf32>
    %c0_4 = arith.constant 0 : index
    %c0_5 = arith.constant 0 : index
    %8 = vector.load %arg1[%c0_4, %c0_5] : memref<8x192xf32, #tpu.memory_space<vmem>>, vector<8x192xf32>
    %cst = arith.constant dense<0.000000e+00> : vector<8x128xf32>
    %9 = tpu.matmul %8, %0, %cst {dimension_numbers = #tpu.dot_dimension_numbers<[1], [0], [0], [1], [0, 0, 1, 1], [], []>} : vector<8x192xf32>, vector<192x128xf32>, vector<8x128xf32> -> vector<8x128xf32>
    %10 = vector.broadcast %4 : vector<1x128xf32> to vector<8x128xf32>
    %11 = arith.addf %9, %10 : vector<8x128xf32>
    %12 = vector.broadcast %5 : vector<1x128xf32> to vector<8x128xf32>
    %13 = arith.maximumf %11, %12 : vector<8x128xf32>
    %cst_6 = arith.constant dense<0.000000e+00> : vector<8x128xf32>
    %14 = tpu.matmul %13, %1, %cst_6 {dimension_numbers = #tpu.dot_dimension_numbers<[1], [0], [0], [1], [0, 0, 1, 1], [], []>} : vector<8x128xf32>, vector<128x128xf32>, vector<8x128xf32> -> vector<8x128xf32>
    %15 = vector.broadcast %6 : vector<1x128xf32> to vector<8x128xf32>
    %16 = arith.addf %14, %15 : vector<8x128xf32>
    %cst_7 = arith.constant 0.000000e+00 : f32
    %17 = vector.broadcast %cst_7 : f32 to vector<8x128xf32>
    %18 = arith.maximumf %16, %17 : vector<8x128xf32>
    %cst_8 = arith.constant dense<0.000000e+00> : vector<8x128xf32>
    %19 = tpu.matmul %18, %2, %cst_8 {dimension_numbers = #tpu.dot_dimension_numbers<[1], [0], [0], [1], [0, 0, 1, 1], [], []>} : vector<8x128xf32>, vector<128x128xf32>, vector<8x128xf32> -> vector<8x128xf32>
    %20 = vector.broadcast %7 : vector<1x128xf32> to vector<8x128xf32>
    %21 = arith.addf %19, %20 : vector<8x128xf32>
    %22 = vector.extract_strided_slice %21 {offsets = [0, 0], sizes = [8, 8], strides = [1, 1]} : vector<8x128xf32> to vector<8x8xf32>
    %c0_9 = arith.constant 0 : index
    %c0_10 = arith.constant 0 : index
    %23 = vector.load %arg3[%c0_9, %c0_10] : memref<8x8xf32, #tpu.memory_space<vmem>>, vector<8x8xf32>
    tpu.vector_store %arg3[%c0_9, %c0_10], %22 {strides = array<i32>} : memref<8x8xf32, #tpu.memory_space<vmem>>, vector<8x8xf32>,
    return
  }
  func.func @transform_0(%arg0: i32) -> (i32, i32) {
    %c0_i32 = arith.constant 0 : i32
    %c0_i32_0 = arith.constant 0 : i32
    return %arg0, %c0_i32 : i32, i32
  }
  func.func @transform_1(%arg0: i32) -> (i32, i32) {
    %c0_i32 = arith.constant 0 : i32
    %c0_i32_0 = arith.constant 0 : i32
    %c0_i32_1 = arith.constant 0 : i32
    return %c0_i32, %c0_i32_0 : i32, i32
  }
  func.func @transform_2(%arg0: i32) -> (i32, i32) {
    %c0_i32 = arith.constant 0 : i32
    %c0_i32_0 = arith.constant 0 : i32
    return %arg0, %c0_i32 : i32, i32
  }
}

</mosaic_0001>

<bundles_post_ra>
// kernel: tpu_custom_call.1
= control target key start
LH: loop header
LB: loop body
LE: loop exit
PB: predicated region body
PF: predicated region fallthrough
CT: control target
= control target key end

     0   :  { %7 = vsyncpa [#allocation3], 0  ;;  %s712_s0 = inlined_call_operand.hbm [shape: f32[8,192], index: 0, kind: input, shape index: {}]   ;;  %s713_s1 = inlined_call_operand.hbm [shape: f32[456,128], index: 1, kind: input, shape index: {}]   ;;  %s714_s2 = inlined_call_operand.hbm [shape: f32[8,8], index: 2, kind: output, shape index: {}]  }
   0x1   :  { %8 = vsyncpa [#allocation6], 0 }
   0x2   :  { %9 = vsyncpa [#allocation4], 0  ;;  %s616_s9 = smov [#allocation2]   ;;  %s617_s11 = smov [#allocation5]  }
   0x3   :  { %s16_s10 = sshll.u32 %s616_s9, 4  ;;  %s25_s12 = sshll.u32 %s617_s11, 4  ;;  %s17_s10 = int_to_ptr.vmem [resolvable:$true] %s16_s10  ;;  %s639_s12 = int_to_ptr.vmem [resolvable:$true] %s25_s12 }
   0x4   :  { %s544_s15 = scalar_lea.hbm %s712_s0, 256 }
   0x5   :  { %p545_p0 = scmp.ne.s32.totalorder %s712_s0, %s544_s15  ;;  %p548_p1 = scmp.lt.u32.totalorder %s544_s15, %s712_s0 }
   0x7   :  { %p550_p2 = pnand %p548_p1, %p545_p0 }
   0x9   :  { %553 = shalt.err (!%p550_p2)
}
   0xa   :  { %s554_s20 = scalar_lea.vmem %s17_s10, 256  ;;  %p559_p4 = scmp.lt.s32.totalorder %s17_s10, %s17_s10 }
   0xb   :  { %p555_p3 = scmp.ne.s32.totalorder %s17_s10, %s554_s20  ;;  %p560_p5 = scmp.lt.s32.totalorder %s554_s20, %s554_s20 }
   0xd   :  { %p561_p6 = por %p560_p5, %p559_p4 }
   0xf   :  { %p562_p7 = pnand %p561_p6, %p555_p3 }
  0x11   :  { %565 = shalt.err (!%p562_p7)
}
  0x12   :  { %19 = dma.hbm_to_vmem [thread:$0]  %s712_s0, 256, %s17_s10, [#allocation3]  }
  0x13   :  { %s566_s25 = scalar_lea.hbm %s713_s1, 7296 }
  0x14   :  { %p567_p8 = scmp.ne.s32.totalorder %s713_s1, %s566_s25  ;;  %p570_p9 = scmp.lt.u32.totalorder %s566_s25, %s713_s1 }
  0x16   :  { %p572_p10 = pnand %p570_p9, %p567_p8 }
  0x18   :  { %575 = shalt.err (!%p572_p10)
}
  0x19   :  { %s576_s30 = scalar_lea.vmem %s639_s12, 7296  ;;  %p581_p12 = scmp.lt.s32.totalorder %s639_s12, %s639_s12 }
  0x1a   :  { %p577_p11 = scmp.ne.s32.totalorder %s639_s12, %s576_s30  ;;  %p582_p13 = scmp.lt.s32.totalorder %s576_s30, %s576_s30 }
  0x1c   :  { %p583_p0 = por %p582_p13, %p581_p12 }
  0x1e   :  { %p584_p1 = pnand %p583_p0, %p577_p11 }
  0x20   :  { %587 = shalt.err (!%p584_p1)
}
  0x21   :  { %s618_s0 = smov 128   ;;  %s619_s3 = smov 8  }
  0x22   :  { %31 = dma.hbm_to_vmem [thread:$0]  %s713_s1, 7296, %s639_s12, [#allocation6], %s618_s0, %s618_s0, %s619_s3  }
  0x23   :  { %610 = dma.done.wait [#allocation3], 256  }
  0x24   :  { %611 = vsyncadd [#allocation3], 4294967040 }
  0x25   :  { %612 = dma.done.wait [#allocation6], 7296  }
  0x26   :  { %613 = vsyncadd [#allocation6], 4294960000  ;;  %v620_v0 = vmov 0.0|0.0   ;;  %v38_v1 = vld [vmem:[#allocation5] sm:$0xff]  ;;  %v39_v2 = vld [vmem:[#allocation5 + $0x8] sm:$0xff]  ;;  %vm101_vm0 = vcmask 523264  }
  0x27   :  { %452 = vmatprep.subr.bf16.mxu0 %v620_v0  ;;  %488 = vmatprep.subr.bf16.mxu1 %v620_v0  ;;  %v40_v3 = vld [vmem:[#allocation5 + $0x10] sm:$0xff]  ;;  %v453_v4 = vpack.c.bf16 %v39_v2, %v38_v1  ;;  %v41_v5 = vld [vmem:[#allocation5 + $0x18] sm:$0xff]  ;;  %v42_v7 = vld [vmem:[#allocation5 + $0x20] sm:$0xff]  ;;  %vm621_vm1 = vmmov 0   ;;  %v622_v63 = vmov 0.0   ;;  %v97_v1 = vlaneseq  ;;  %s623_s1 = smov [#allocation7]  }
  0x28   :  { %v456_v6 = vpack.c.bf16 %v41_v5, %v40_v3  ;;  %v43_v8 = vld [vmem:[#allocation5 + $0x28] sm:$0xff]  ;;  %v44_v10 = vld [vmem:[#allocation5 + $0x30] sm:$0xff]  ;;  %v45_v11 = vld [vmem:[#allocation5 + $0x38] sm:$0xff]  ;;  %414 = vmatprep.mubr.msk.f32.mxu1 %vm621_vm1, %v622_v63  ;;  %s337_s6 = sshll.u32 %s623_s1, 4  ;;  %vm329_vm2 = vcmask 64512   ;;  %s338_s6 = int_to_ptr.vmem [resolvable:$true] %s337_s6 }
  0x29   :  { %454 = vmatpush1.bf16.msra.mxu0 %v453_v4  ;;  %v459_v9 = vpack.c.bf16 %v43_v8, %v42_v7  ;;  %v96_v12 = vld [vmem:[#allocation2 + $0x8] sm:$0xff]  ;;  %v62_v13 = vld [vmem:[#allocation5 + $0xc0] sm:$0xff]  ;;  %v63_v14 = vld [vmem:[#allocation5 + $0xc8] sm:$0xff]  ;;  %v462_v18 = vpack.c.bf16 %v45_v11, %v44_v10  ;;  %v98_v2 = vshrl.u32 %v97_v1, 7  ;;  %s588_s7 = scalar_lea.vmem %s338_s6, 128  ;;  %p593_p3 = scmp.lt.s32.totalorder %s338_s6, %s338_s6 }
  0x2a   :  { %455 = vmatprep.subr.bf16.mxu0 %v620_v0  ;;  %347 = vmatprep.mubr.msk.f32.mxu0 %vm101_vm0, %v96_v12  ;;  %v64_v15 = vld [vmem:[#allocation5 + $0xd0] sm:$0xff]  ;;  %v65_v16 = vld [vmem:[#allocation5 + $0xd8] sm:$0xff]  ;;  %v489_v17 = vpack.c.bf16 %v63_v14, %v62_v13  ;;  %v46_v19 = vld [vmem:[#allocation5 + $0x40] sm:$0xff]  ;;  %p589_p2 = scmp.ne.s32.totalorder %s338_s6, %s588_s7  ;;  %p594_p4 = scmp.lt.s32.totalorder %s588_s7, %s588_s7 }
  0x2b   :  { %v47_v20 = vld [vmem:[#allocation5 + $0x48] sm:$0xff]  ;;  %v492_v21 = vpack.c.bf16 %v65_v16, %v64_v15  ;;  %v66_v22 = vld [vmem:[#allocation5 + $0xe0] sm:$0xff]  ;;  %v48_v25 = vld [vmem:[#allocation5 + $0x50] sm:$0xff]  ;;  %v99_v3 = vsub.s32 0, %v98_v2  ;;  %v177_v5 = vsub.s32 1, %v98_v2 }
  0x2c   :  { %490 = vmatpush3.bf16.msra.mxu1 %v489_v17  ;;  %v67_v23 = vld [vmem:[#allocation5 + $0xe8] sm:$0xff]  ;;  %v465_v24 = vpack.c.bf16 %v47_v20, %v46_v19  ;;  %v49_v26 = vld [vmem:[#allocation5 + $0x58] sm:$0xff]  ;;  %v68_v28 = vld [vmem:[#allocation5 + $0xf0] sm:$0xff]  ;;  %p595_p5 = por %p594_p4, %p593_p3 }
  0x2d   :  { %457 = vmatpush1.bf16.msra.mxu0 %v456_v6  ;;  %491 = vmatprep.subr.bf16.mxu1 %v620_v0  ;;  %v495_v27 = vpack.c.bf16 %v67_v23, %v66_v22  ;;  %v69_v29 = vld [vmem:[#allocation5 + $0xf8] sm:$0xff]  ;;  %v468_v30 = vpack.c.bf16 %v49_v26, %v48_v25  ;;  %v50_v31 = vld [vmem:[#allocation5 + $0x60] sm:$0xff]  ;;  %v51_v32 = vld [vmem:[#allocation5 + $0x68] sm:$0xff] }
  0x2e   :  { %458 = vmatprep.subr.bf16.mxu0 %v620_v0  ;;  %v498_v33 = vpack.c.bf16 %v69_v29, %v68_v28  ;;  %v70_v34 = vld [vmem:[#allocation5 + $0x100] sm:$0xff]  ;;  %v71_v35 = vld [vmem:[#allocation5 + $0x108] sm:$0xff]  ;;  %v471_v36 = vpack.c.bf16 %v51_v32, %v50_v31  ;;  %v52_v37 = vld [vmem:[#allocation5 + $0x70] sm:$0xff]  ;;  %p596_p6 = pnand %p595_p5, %p589_p2 }
  0x2f   :  { %v53_v38 = vld [vmem:[#allocation5 + $0x78] sm:$0xff]  ;;  %v501_v39 = vpack.c.bf16 %v71_v35, %v70_v34  ;;  %v72_v40 = vld [vmem:[#allocation5 + $0x110] sm:$0xff]  ;;  %v54_v43 = vld [vmem:[#allocation5 + $0x80] sm:$0xff] }
  0x30   :  { %493 = vmatpush3.bf16.msra.mxu1 %v492_v21  ;;  %v73_v41 = vld [vmem:[#allocation5 + $0x118] sm:$0xff]  ;;  %v474_v42 = vpack.c.bf16 %v53_v38, %v52_v37  ;;  %v55_v44 = vld [vmem:[#allocation5 + $0x88] sm:$0xff]  ;;  %v74_v46 = vld [vmem:[#allocation5 + $0x120] sm:$0xff] }
  0x31   :  { %460 = vmatpush1.bf16.msra.mxu0 %v459_v9  ;;  %494 = vmatprep.subr.bf16.mxu1 %v620_v0  ;;  %v504_v45 = vpack.c.bf16 %v73_v41, %v72_v40  ;;  %v75_v47 = vld [vmem:[#allocation5 + $0x128] sm:$0xff]  ;;  %v477_v48 = vpack.c.bf16 %v55_v44, %v54_v43  ;;  %v56_v49 = vld [vmem:[#allocation5 + $0x90] sm:$0xff]  ;;  %v57_v50 = vld [vmem:[#allocation5 + $0x98] sm:$0xff] }
  0x32   :  { %461 = vmatprep.subr.bf16.mxu0 %v620_v0  ;;  %v507_v51 = vpack.c.bf16 %v75_v47, %v74_v46  ;;  %v480_v52 = vpack.c.bf16 %v57_v50, %v56_v49  ;;  %v58_v53 = vld [vmem:[#allocation5 + $0xa0] sm:$0xff]  ;;  %v59_v54 = vld [vmem:[#allocation5 + $0xa8] sm:$0xff]  ;;  %v60_v56 = vld [vmem:[#allocation5 + $0xb0] sm:$0xff] }
  0x33   :  { %v483_v55 = vpack.c.bf16 %v59_v54, %v58_v53  ;;  %v61_v57 = vld [vmem:[#allocation5 + $0xb8] sm:$0xff]  ;;  %v95_v59 = vld [vmem:[#allocation2] sm:$0xff]  ;;  %v94_v4 = vld [vmem:[#allocation5 + $0x1c0] sm:$0xff] }
  0x34   :  { %496 = vmatpush3.bf16.msra.mxu1 %v495_v27  ;;  %v486_v58 = vpack.c.bf16 %v61_v57, %v60_v56  ;;  %v76_v60 = vld [vmem:[#allocation5 + $0x130] sm:$0xff]  ;;  %v77_v61 = vld [vmem:[#allocation5 + $0x138] sm:$0xff]  ;;  %v100_v6 = vrot.slane %v94_v4, %v99_v3  ;;  %v178_v7 = vrot.slane %v94_v4, %v177_v5  ;;  %v78_v8 = vld [vmem:[#allocation5 + $0x140] sm:$0xff] }
  0x35   :  { %463 = vmatpush1.bf16.msra.mxu0 %v462_v18  ;;  %497 = vmatprep.subr.bf16.mxu1 %v620_v0  ;;  %v510_v62 = vpack.c.bf16 %v77_v61, %v76_v60  ;;  %v79_v9 = vld [vmem:[#allocation5 + $0x148] sm:$0xff]  ;;  %v80_v15 = vld [vmem:[#allocation5 + $0x150] sm:$0xff]  ;;  %v81_v16 = vld [vmem:[#allocation5 + $0x158] sm:$0xff] }
  0x36   :  { %464 = vmatprep.subr.bf16.mxu0 %v620_v0  ;;  %v513_v13 = vpack.c.bf16 %v79_v9, %v78_v8  ;;  %v516_v17 = vpack.c.bf16 %v81_v16, %v80_v15  ;;  %v82_v18 = vld [vmem:[#allocation5 + $0x160] sm:$0xff]  ;;  %v83_v19 = vld [vmem:[#allocation5 + $0x168] sm:$0xff]  ;;  %v84_v21 = vld [vmem:[#allocation5 + $0x170] sm:$0xff] }
  0x37   :  { %v519_v20 = vpack.c.bf16 %v83_v19, %v82_v18  ;;  %v85_v22 = vld [vmem:[#allocation5 + $0x178] sm:$0xff]  ;;  %v87_v25 = vld [vmem:[#allocation5 + $0x188] sm:$0xff]  ;;  %v88_v27 = vld [vmem:[#allocation5 + $0x190] sm:$0xff] }
  0x38   :  { %499 = vmatpush3.bf16.msra.mxu1 %v498_v33  ;;  %v522_v23 = vpack.c.bf16 %v85_v22, %v84_v21  ;;  %v89_v28 = vld [vmem:[#allocation5 + $0x198] sm:$0xff]  ;;  %v91_v31 = vld [vmem:[#allocation5 + $0x1a8] sm:$0xff]  ;;  %v92_v33 = vld [vmem:[#allocation5 + $0x1b0] sm:$0xff] }
  0x39   :  { %466 = vmatpush1.bf16.msra.mxu0 %v465_v24  ;;  %500 = vmatprep.subr.bf16.mxu1 %v620_v0  ;;  %v86_v24 = vld [vmem:[#allocation5 + $0x180] sm:$0xff]  ;;  %v528_v29 = vpack.c.bf16 %v89_v28, %v88_v27  ;;  %v93_v34 = vld [vmem:[#allocation5 + $0x1b8] sm:$0xff] }
  0x3a   :  { %467 = vmatprep.subr.bf16.mxu0 %v620_v0  ;;  %v525_v26 = vpack.c.bf16 %v87_v25, %v86_v24  ;;  %v534_v35 = vpack.c.bf16 %v93_v34, %v92_v33 }
  0x3c   :  { %502 = vmatpush3.bf16.msra.mxu1 %v501_v39 }
  0x3d   :  { %469 = vmatpush1.bf16.msra.mxu0 %v468_v30  ;;  %503 = vmatprep.subr.bf16.mxu1 %v620_v0  ;;  %v90_v30 = vld [vmem:[#allocation5 + $0x1a0] sm:$0xff] }
  0x3e   :  { %470 = vmatprep.subr.bf16.mxu0 %v620_v0  ;;  %v531_v32 = vpack.c.bf16 %v91_v31, %v90_v30 }
  0x40   :  { %505 = vmatpush3.bf16.msra.mxu1 %v504_v45 }
  0x41   :  { %472 = vmatpush1.bf16.msra.mxu0 %v471_v36  ;;  %506 = vmatprep.subr.bf16.mxu1 %v620_v0  ;;  %v182_v36 = vsub.s32 2, %v98_v2 }
  0x42   :  { %473 = vmatprep.subr.bf16.mxu0 %v620_v0 }
  0x43   :  { %v183_v37 = vrot.slane %v94_v4, %v182_v36 }
  0x44   :  { %508 = vmatpush3.bf16.msra.mxu1 %v507_v51 }
  0x45   :  { %475 = vmatpush1.bf16.msra.mxu0 %v474_v42  ;;  %509 = vmatprep.subr.bf16.mxu1 %v620_v0  ;;  %v257_v42 = vsub.s32 3, %v98_v2 }
  0x46   :  { %476 = vmatprep.subr.bf16.mxu0 %v620_v0 }
  0x47   :  { %v258_v43 = vrot.slane %v94_v4, %v257_v42 }
  0x48   :  { %511 = vmatpush3.bf16.msra.mxu1 %v510_v62 }
  0x49   :  { %478 = vmatpush1.bf16.msra.mxu0 %v477_v48  ;;  %512 = vmatprep.subr.bf16.mxu1 %v620_v0 }
  0x4a   :  { %479 = vmatprep.subr.bf16.mxu0 %v620_v0 }
  0x4d   :  { %481 = vmatpush1.bf16.msra.mxu0 %v480_v52 }
  0x4e   :  { %482 = vmatprep.subr.bf16.mxu0 %v620_v0 }
  0x51   :  { %484 = vmatpush1.bf16.msra.mxu0 %v483_v55 }
  0x52   :  { %485 = vmatprep.subr.bf16.mxu0 %v620_v0 }
  0x55   :  { %487 = vmatpush1.bf16.msra.mxu0 %v486_v58 }
  0x58   :  { %170 = vmatmul.mubr.f32.vlgmr.msra.gmra.mrb[0].mxu0 %v95_v59 }
 0x12b   :  { %v171_v10 = vpop.f32.mrb[0].mxu0 }
 0x12c   :  { %v172_v11 = vadd.f32 %v171_v10, %v100_v6  ;;  %v173_v12 = vpop.f32.mrb[1].mxu0 }
 0x12e   :  { %v179_v14 = vmax.f32 %v172_v11, %v178_v7 }
 0x130   :  { %415 = vmatmul.mubr.f32.vlgmr.msra.gmra.mrb[0].mxu1 %v179_v14 }
 0x131   :  { %514 = vmatpush3.bf16.msra.mxu1 %v513_v13  ;;  %449 = vmatprep.mubr.msk.f32.mxu1 %vm621_vm1, %v622_v63 }
 0x132   :  { %515 = vmatprep.subr.bf16.mxu1 %v620_v0 }
 0x135   :  { %517 = vmatpush3.bf16.msra.mxu1 %v516_v17 }
 0x136   :  { %518 = vmatprep.subr.bf16.mxu1 %v620_v0 }
 0x139   :  { %520 = vmatpush3.bf16.msra.mxu1 %v519_v20 }
 0x13a   :  { %521 = vmatprep.subr.bf16.mxu1 %v620_v0 }
 0x13d   :  { %523 = vmatpush3.bf16.msra.mxu1 %v522_v23 }
 0x13e   :  { %524 = vmatprep.subr.bf16.mxu1 %v620_v0 }
 0x141   :  { %526 = vmatpush3.bf16.msra.mxu1 %v525_v26 }
 0x142   :  { %527 = vmatprep.subr.bf16.mxu1 %v620_v0 }
 0x145   :  { %529 = vmatpush3.bf16.msra.mxu1 %v528_v29 }
 0x146   :  { %530 = vmatprep.subr.bf16.mxu1 %v620_v0 }
 0x149   :  { %532 = vmatpush3.bf16.msra.mxu1 %v531_v32 }
 0x14a   :  { %533 = vmatprep.subr.bf16.mxu1 %v620_v0 }
 0x14d   :  { %535 = vmatpush3.bf16.msra.mxu1 %v534_v35 }
 0x203   :  { %v250_v38 = vpop.f32.mrb[0].mxu1 }
 0x204   :  { %v251_v39 = vadd.f32 %v250_v38, %v183_v37  ;;  %v416_v40 = vpop.f32.mrb[1].mxu1 }
 0x206   :  { %v254_v41 = vmax.f32 %v251_v39, 0.0 }
 0x208   :  { %450 = vmatmul.mubr.f32.vlgmr.msra.gmra.mrb[2].mxu1 %v254_v41 }
 0x2db   :  { %v325_v44 = vpop.f32.mrb[2].mxu1 }
 0x2dc   :  { %v326_v45 = vadd.f32 %v325_v44, %v258_v43  ;;  %v451_v46 = vpop.f32.mrb[3].mxu1 }
 0x2de   :  { %330 = vst.msk [vmem:[#allocation7] sm:$0xff] %vm329_vm2, %v326_v45 }
 0x2df   :  { %599 = shalt.err (!%p596_p6)
}
 0x2e0   :  { %s600_s10 = scalar_lea.hbm %s714_s2, 128 }
 0x2e1   :  { %p601_p7 = scmp.ne.s32.totalorder %s714_s2, %s600_s10  ;;  %p604_p8 = scmp.lt.u32.totalorder %s600_s10, %s714_s2 }
 0x2e3   :  { %p606_p9 = pnand %p604_p8, %p601_p7 }
 0x2e5   :  { %609 = shalt.err (!%p606_p9)
}
 0x2e6   :  { %340 = dma.vmem_to_hbm [thread:$0]  %s338_s6, 128, %s714_s2, [#allocation4]  }
 0x2e7   :  { %614 = dma.done.wait [#allocation4], 128  }
 0x2e8   :  { %615 = vsyncadd [#allocation4], 4294967168 }
 0x2e9   :  { %344 = vsyncpa [#allocation3], 1 }
 0x2ea   :  { %345 = vsyncpa [#allocation6], 1 }
 0x2eb   :  { %346 = vsyncpa [#allocation4], 1 }

</bundles_post_ra>
